<compile_context>
chip_gen: v7x
topology: tpu7x:2x2x1
jax: 0.10.0
libtpu: 0.0.40
codegen_flags: <defaults>
</compile_context>

<pallas_src>
import numpy as np
import jax
import jax.numpy as jnp
from jax import lax
from jax.experimental import pallas as pl
from jax.experimental.pallas import tpu as pltpu

SCALES = (1, 2, 4, 8)


# ---------------------------------------------------------------------------
# Host-side structural matrices (all tiny, built once).
# ---------------------------------------------------------------------------
def _line_interp(out_n, in_n):
    """(out_n, in_n): 1-D bilinear interpolation weights, align_corners=True."""
    M = np.zeros((out_n, in_n), np.float32)
    for i in range(out_n):
        if in_n == 1:
            M[i, 0] = 1.0
        else:
            t = i * (in_n - 1) / (out_n - 1)
            i0 = min(int(np.floor(t)), in_n - 2)
            f = t - i0
            M[i, i0] = 1.0 - f
            M[i, i0 + 1] = f
    return M


def _offsets():
    offs = [0]
    for s in SCALES:
        offs.append(offs[-1] + s * s)
    return offs


def _build_structs(H, W):
    """P2 (HW,NP): 0/1 block-sum adaptive pooling, all scales.
       Sh (9,NP,NP): block-diagonal 0/1 shift matrices, one per 3x3 tap
                     (conv zero-padding encoded as zero rows).
       U2 (NP,HW): align_corners bilinear upsample for all scales, stacked."""
    HW = H * W
    offs = _offsets()
    NP = offs[-1]
    P2 = np.zeros((HW, NP), np.float32)
    U2 = np.zeros((NP, HW), np.float32)
    Sh = np.zeros((9, NP, NP), np.float32)
    for i, s in enumerate(SCALES):
        bh, bw = H // s, W // s
        off = offs[i]
        for p in range(s):
            for q in range(s):
                col = off + p * s + q
                for h in range(p * bh, (p + 1) * bh):
                    P2[h * W + q * bw: h * W + (q + 1) * bw, col] = 1.0
        Uh = _line_interp(H, s)
        Uw = _line_interp(W, s)
        U2[off:off + s * s, :] = np.einsum("hp,wq->pqhw", Uh, Uw).reshape(s * s, HW)
        for t in range(9):
            dy, dx = t // 3 - 1, t % 3 - 1
            for p in range(s):
                for q in range(s):
                    ps, qs = p + dy, q + dx
                    if 0 <= ps < s and 0 <= qs < s:
                        Sh[t, off + ps * s + qs, off + p * s + q] = 1.0
    return P2, Sh, U2


# ---------------------------------------------------------------------------
# Fused forward
# ---------------------------------------------------------------------------
def arp_forward(x, params):
    B, C, H, W = x.shape
    assert all(H % s == 0 and W % s == 0 for s in SCALES)
    ns = len(SCALES)
    HW = H * W
    offs = _offsets()
    NP = offs[-1]                                # 85
    f32, bf16 = jnp.float32, jnp.bfloat16

    P2, Sh, U2 = _build_structs(H, W)

    # Fold the 1x1 "cat" conv, the 3x3-conv biases and the pooling
    # normalisation into per-scale weights + one global bias (host side, f32).
    wcat2 = params["wcat"][:, :, 0, 0].astype(f32)                    # (C, 5C)
    bias_total = params["bcat"].astype(f32)
    wf_list = []
    for i, s in enumerate(SCALES):
        wcat_i = wcat2[:, i * C:(i + 1) * C]                          # (o, m)
        norm = 1.0 / ((H // s) * (W // s))
        wmix = jnp.einsum("om,mcij->oijc", wcat_i,
                          params["w3"][i].astype(f32)) * norm         # (o,3,3,c)
        wf_list.append(wmix.reshape(C, 9 * C))                        # col=(3i+j)*C+c
        bias_total = bias_total + wcat_i @ params["b3"][i].astype(f32)
    wf_all = jnp.stack(wf_list).astype(bf16)                          # (ns, C, 9C)
    wx = wcat2[:, ns * C:]                                            # (C, C) f32
    bias_col = bias_total.reshape(C, 1)                               # (C, 1) f32

    # Free reshape of NCHW; stays f32 (cast to bf16 happens inside the kernel).
    x_flat = x.reshape(B, C, HW).astype(f32)

    def kernel(x_ref, p2_ref, sh_ref, wf_ref, wx_ref, u2_ref, b_ref, o_ref):
        xin = x_ref[0]                                                # (C, HW) f32

        # ---- identity 1x1 branch (kept in f32) + fused bias ----
        acc = jnp.dot(wx_ref[...], xin,
                      preferred_element_type=jnp.float32) + b_ref[...]

        # ---- adaptive average pooling, all scales, one matmul (block sums) ----
        xb = xin.astype(jnp.bfloat16)
        pooled = jnp.dot(xb, p2_ref[...],
                         preferred_element_type=jnp.float32)          # (C, NP)
        pooled_b = pooled.astype(jnp.bfloat16)

        # ---- 3x3-conv spatial taps: 9 block-diagonal shift matmuls ----
        sh9 = jnp.concatenate(
            [jnp.dot(pooled_b, sh_ref[t], preferred_element_type=jnp.float32)
             for t in range(9)], axis=0).astype(jnp.bfloat16)         # (9C, NP)

        # ---- per-scale channel mix (3x3 conv + cat-conv slice folded) ----
        col = lax.broadcasted_iota(jnp.int32, (1, NP), 1)
        t_all = jnp.zeros((C, NP), jnp.float32)
        for i, s in enumerate(SCALES):
            y = jnp.dot(wf_ref[i], sh9,
                        preferred_element_type=jnp.float32)           # (C, NP)
            m = (col >= offs[i]) & (col < offs[i + 1])
            t_all = t_all + jnp.where(m, y, 0.0)

        # ---- fused align_corners bilinear upsample of all scales: 1 matmul ----
        up = jnp.dot(t_all.astype(jnp.bfloat16), u2_ref[...],
                     preferred_element_type=jnp.float32)              # (C, HW)

        # ---- single full-block, lane-dense store ----
        o_ref[0] = acc + up

    # Explicit VMEM budget (keeps the same kernel working on v7x's 64 MiB).
    const_bytes = (HW * NP + 9 * NP * NP + NP * HW + ns * C * 9 * C) * 2 \
        + (C * C + C) * 4
    io_bytes = 2 * 2 * (C * HW * 4)            # x + out blocks, double-buffered
    vmem_limit = int(min(112 * 2 ** 20,
                         max(16 * 2 ** 20, 4 * (const_bytes + io_bytes))))

    out = pl.pallas_call(
        kernel,
        out_shape=jax.ShapeDtypeStruct((B, C, HW), jnp.float32),
        grid=(B,),
        in_specs=[
            pl.BlockSpec((1, C, HW), lambda b: (b, 0, 0)),        # x (channels-first)
            pl.BlockSpec((HW, NP), lambda b: (0, 0)),             # pooling (block sums)
            pl.BlockSpec((9, NP, NP), lambda b: (0, 0, 0)),       # 3x3 tap shifts
            pl.BlockSpec((ns, C, 9 * C), lambda b: (0, 0, 0)),    # fused conv weights
            pl.BlockSpec((C, C), lambda b: (0, 0)),               # identity 1x1 slice
            pl.BlockSpec((NP, HW), lambda b: (0, 0)),             # fused upsample
            pl.BlockSpec((C, 1), lambda b: (0, 0)),               # fused bias
        ],
        out_specs=pl.BlockSpec((1, C, HW), lambda b: (b, 0, 0)),
        compiler_params=pltpu.CompilerParams(
            dimension_semantics=("parallel",),
            vmem_limit_bytes=vmem_limit),
    )(x_flat, jnp.asarray(P2, bf16), jnp.asarray(Sh, bf16), wf_all,
      wx, jnp.asarray(U2, bf16), bias_col)

    # (B, C, HW) and (B, C, H, W) share the same memory order -> free reshape.
    return out.reshape(B, C, H, W)


# ---------------------------------------------------------------------------
# Pure-JAX reference (independent implementation) for validation.
# ---------------------------------------------------------------------------
def arp_reference(x, params):
    B, C, H, W = x.shape
    hp = lax.Precision.HIGHEST
    branches = []
    for i, s in enumerate(SCALES):
        bh, bw = H // s, W // s
        pooled = x.reshape(B, C, s, bh, s, bw).mean(axis=(3, 5))
        conv = lax.conv_general_dilated(
            pooled, params["w3"][i], window_strides=(1, 1),
            padding=((1, 1), (1, 1)),
            dimension_numbers=("NCHW", "OIHW", "NCHW"),
            precision=hp) + params["b3"][i][None, :, None, None]
        Wh = jnp.asarray(_line_interp(H, s))
        Ww = jnp.asarray(_line_interp(W, s))
        up = jnp.einsum("hp,bcpq,wq->bchw", Wh, conv, Ww, precision=hp)
        branches.append(up)
    branches.append(x)
    cat = jnp.concatenate(branches, axis=1)
    out = lax.conv_general_dilated(
        cat, params["wcat"], window_strides=(1, 1), padding="VALID",
        dimension_numbers=("NCHW", "OIHW", "NCHW"),
        precision=hp) + params["bcat"][None, :, None, None]
    return out


if __name__ == "__main__":
    B, C, H, W = 2, 4, 16, 16
    key = jax.random.PRNGKey(0)
    ks = jax.random.split(key, 11)
    w3 = [0.1 * jax.random.normal(ks[i], (C, C, 3, 3), jnp.float32)
          for i in range(len(SCALES))]
    b3 = [0.05 * jax.random.normal(ks[len(SCALES) + i], (C,), jnp.float32)
          for i in range(len(SCALES))]
    wcat = 0.1 * jax.random.normal(ks[8], (C, (len(SCALES) + 1) * C, 1, 1),
                                   jnp.float32)
    bcat = 0.05 * jax.random.normal(ks[9], (C,), jnp.float32)
    x = jax.random.normal(ks[10], (B, C, H, W), jnp.float32)
    params = {"w3": w3, "b3": b3, "wcat": wcat, "bcat": bcat}

    out = jax.block_until_ready(arp_forward(x, params))
    ref = arp_reference(x, params)
    # pooled-branch matmul operands are bf16 -> slightly loose tolerance
    np.testing.assert_allclose(np.asarray(out), np.asarray(ref),
                               rtol=2e-2, atol=2e-2)
    print("KERNEL_OK")
</pallas_src>

<mosaic_0001>
module attributes {stable_mosaic.version = 11 : i64} {
  func.func @kernel(%arg0: i32, %arg1: memref<1x4x256xf32, #tpu.memory_space<vmem>>, %arg2: memref<256x85xbf16, #tpu.memory_space<vmem>>, %arg3: memref<9x85x85xbf16, #tpu.memory_space<vmem>>, %arg4: memref<4x4x36xbf16, #tpu.memory_space<vmem>>, %arg5: memref<4x4xf32, #tpu.memory_space<vmem>>, %arg6: memref<85x256xbf16, #tpu.memory_space<vmem>>, %arg7: memref<4x1xf32, #tpu.memory_space<vmem>>, %arg8: memref<1x4x256xf32, #tpu.memory_space<vmem>>) attributes {dimension_semantics = [#tpu.dimension_semantics<parallel>], iteration_bounds = array<i64: 2>, scalar_prefetch = 0 : i64, scratch_operands = 0 : i64, tpu.core_type = #tpu.core_type<tc>, window_params = [{transform_indices = @transform_0, window_bounds = array<i64: 1, 4, 256>}, {pipeline_mode = #tpu.pipeline_mode<synchronous>, transform_indices = @transform_1, window_bounds = array<i64: 256, 85>}, {pipeline_mode = #tpu.pipeline_mode<synchronous>, transform_indices = @transform_2, window_bounds = array<i64: 9, 85, 85>}, {pipeline_mode = #tpu.pipeline_mode<synchronous>, transform_indices = @transform_3, window_bounds = array<i64: 4, 4, 36>}, {pipeline_mode = #tpu.pipeline_mode<synchronous>, transform_indices = @transform_4, window_bounds = array<i64: 4, 4>}, {pipeline_mode = #tpu.pipeline_mode<synchronous>, transform_indices = @transform_5, window_bounds = array<i64: 85, 256>}, {pipeline_mode = #tpu.pipeline_mode<synchronous>, transform_indices = @transform_6, window_bounds = array<i64: 4, 1>}, {transform_indices = @transform_7, window_bounds = array<i64: 1, 4, 256>}]} {
    %c0 = arith.constant 0 : index
    %c0_0 = arith.constant 0 : index
    %c0_1 = arith.constant 0 : index
    %0 = vector.load %arg1[%c0, %c0_0, %c0_1] : memref<1x4x256xf32, #tpu.memory_space<vmem>>, vector<1x4x256xf32>
    %1 = vector.shape_cast %0 : vector<1x4x256xf32> to vector<4x256xf32>
    %c0_2 = arith.constant 0 : index
    %c0_3 = arith.constant 0 : index
    %2 = vector.load %arg5[%c0_2, %c0_3] : memref<4x4xf32, #tpu.memory_space<vmem>>, vector<4x4xf32>
    %cst = arith.constant dense<0.000000e+00> : vector<4x256xf32>
    %3 = tpu.matmul %2, %1, %cst {dimension_numbers = #tpu.dot_dimension_numbers<[1], [0], [0], [1], [0, 0, 1, 1], [], []>} : vector<4x4xf32>, vector<4x256xf32>, vector<4x256xf32> -> vector<4x256xf32>
    %c0_4 = arith.constant 0 : index
    %c0_5 = arith.constant 0 : index
    %4 = vector.load %arg7[%c0_4, %c0_5] : memref<4x1xf32, #tpu.memory_space<vmem>>, vector<4x1xf32>
    %5 = vector.broadcast %4 : vector<4x1xf32> to vector<4x256xf32>
    %6 = arith.addf %3, %5 : vector<4x256xf32>
    %7 = arith.truncf %1 : vector<4x256xf32> to vector<4x256xbf16>
    %c0_6 = arith.constant 0 : index
    %c0_7 = arith.constant 0 : index
    %8 = vector.load %arg2[%c0_6, %c0_7] : memref<256x85xbf16, #tpu.memory_space<vmem>>, vector<256x85xbf16>
    %cst_8 = arith.constant dense<0.000000e+00> : vector<4x85xf32>
    %9 = tpu.matmul %7, %8, %cst_8 {dimension_numbers = #tpu.dot_dimension_numbers<[1], [0], [0], [1], [0, 0, 1, 1], [], []>} : vector<4x256xbf16>, vector<256x85xbf16>, vector<4x85xf32> -> vector<4x85xf32>
    %10 = arith.truncf %9 : vector<4x85xf32> to vector<4x85xbf16>
    %c0_9 = arith.constant 0 : index
    %c0_10 = arith.constant 0 : index
    %c0_11 = arith.constant 0 : index
    %11 = vector.load %arg3[%c0_9, %c0_10, %c0_11] : memref<9x85x85xbf16, #tpu.memory_space<vmem>>, vector<1x85x85xbf16>
    %12 = vector.shape_cast %11 : vector<1x85x85xbf16> to vector<85x85xbf16>
    %cst_12 = arith.constant dense<0.000000e+00> : vector<4x85xf32>
    %13 = tpu.matmul %10, %12, %cst_12 {dimension_numbers = #tpu.dot_dimension_numbers<[1], [0], [0], [1], [0, 0, 1, 1], [], []>} : vector<4x85xbf16>, vector<85x85xbf16>, vector<4x85xf32> -> vector<4x85xf32>
    %c1 = arith.constant 1 : index
    %c0_13 = arith.constant 0 : index
    %c0_14 = arith.constant 0 : index
    %14 = vector.load %arg3[%c1, %c0_13, %c0_14] : memref<9x85x85xbf16, #tpu.memory_space<vmem>>, vector<1x85x85xbf16>
    %15 = vector.shape_cast %14 : vector<1x85x85xbf16> to vector<85x85xbf16>
    %cst_15 = arith.constant dense<0.000000e+00> : vector<4x85xf32>
    %16 = tpu.matmul %10, %15, %cst_15 {dimension_numbers = #tpu.dot_dimension_numbers<[1], [0], [0], [1], [0, 0, 1, 1], [], []>} : vector<4x85xbf16>, vector<85x85xbf16>, vector<4x85xf32> -> vector<4x85xf32>
    %c2 = arith.constant 2 : index
    %c0_16 = arith.constant 0 : index
    %c0_17 = arith.constant 0 : index
    %17 = vector.load %arg3[%c2, %c0_16, %c0_17] : memref<9x85x85xbf16, #tpu.memory_space<vmem>>, vector<1x85x85xbf16>
    %18 = vector.shape_cast %17 : vector<1x85x85xbf16> to vector<85x85xbf16>
    %cst_18 = arith.constant dense<0.000000e+00> : vector<4x85xf32>
    %19 = tpu.matmul %10, %18, %cst_18 {dimension_numbers = #tpu.dot_dimension_numbers<[1], [0], [0], [1], [0, 0, 1, 1], [], []>} : vector<4x85xbf16>, vector<85x85xbf16>, vector<4x85xf32> -> vector<4x85xf32>
    %c3 = arith.constant 3 : index
    %c0_19 = arith.constant 0 : index
    %c0_20 = arith.constant 0 : index
    %20 = vector.load %arg3[%c3, %c0_19, %c0_20] : memref<9x85x85xbf16, #tpu.memory_space<vmem>>, vector<1x85x85xbf16>
    %21 = vector.shape_cast %20 : vector<1x85x85xbf16> to vector<85x85xbf16>
    %cst_21 = arith.constant dense<0.000000e+00> : vector<4x85xf32>
    %22 = tpu.matmul %10, %21, %cst_21 {dimension_numbers = #tpu.dot_dimension_numbers<[1], [0], [0], [1], [0, 0, 1, 1], [], []>} : vector<4x85xbf16>, vector<85x85xbf16>, vector<4x85xf32> -> vector<4x85xf32>
    %c4 = arith.constant 4 : index
    %c0_22 = arith.constant 0 : index
    %c0_23 = arith.constant 0 : index
    %23 = vector.load %arg3[%c4, %c0_22, %c0_23] : memref<9x85x85xbf16, #tpu.memory_space<vmem>>, vector<1x85x85xbf16>
    %24 = vector.shape_cast %23 : vector<1x85x85xbf16> to vector<85x85xbf16>
    %cst_24 = arith.constant dense<0.000000e+00> : vector<4x85xf32>
    %25 = tpu.matmul %10, %24, %cst_24 {dimension_numbers = #tpu.dot_dimension_numbers<[1], [0], [0], [1], [0, 0, 1, 1], [], []>} : vector<4x85xbf16>, vector<85x85xbf16>, vector<4x85xf32> -> vector<4x85xf32>
    %c5 = arith.constant 5 : index
    %c0_25 = arith.constant 0 : index
    %c0_26 = arith.constant 0 : index
    %26 = vector.load %arg3[%c5, %c0_25, %c0_26] : memref<9x85x85xbf16, #tpu.memory_space<vmem>>, vector<1x85x85xbf16>
    %27 = vector.shape_cast %26 : vector<1x85x85xbf16> to vector<85x85xbf16>
    %cst_27 = arith.constant dense<0.000000e+00> : vector<4x85xf32>
    %28 = tpu.matmul %10, %27, %cst_27 {dimension_numbers = #tpu.dot_dimension_numbers<[1], [0], [0], [1], [0, 0, 1, 1], [], []>} : vector<4x85xbf16>, vector<85x85xbf16>, vector<4x85xf32> -> vector<4x85xf32>
    %c6 = arith.constant 6 : index
    %c0_28 = arith.constant 0 : index
    %c0_29 = arith.constant 0 : index
    %29 = vector.load %arg3[%c6, %c0_28, %c0_29] : memref<9x85x85xbf16, #tpu.memory_space<vmem>>, vector<1x85x85xbf16>
    %30 = vector.shape_cast %29 : vector<1x85x85xbf16> to vector<85x85xbf16>
    %cst_30 = arith.constant dense<0.000000e+00> : vector<4x85xf32>
    %31 = tpu.matmul %10, %30, %cst_30 {dimension_numbers = #tpu.dot_dimension_numbers<[1], [0], [0], [1], [0, 0, 1, 1], [], []>} : vector<4x85xbf16>, vector<85x85xbf16>, vector<4x85xf32> -> vector<4x85xf32>
    %c7 = arith.constant 7 : index
    %c0_31 = arith.constant 0 : index
    %c0_32 = arith.constant 0 : index
    %32 = vector.load %arg3[%c7, %c0_31, %c0_32] : memref<9x85x85xbf16, #tpu.memory_space<vmem>>, vector<1x85x85xbf16>
    %33 = vector.shape_cast %32 : vector<1x85x85xbf16> to vector<85x85xbf16>
    %cst_33 = arith.constant dense<0.000000e+00> : vector<4x85xf32>
    %34 = tpu.matmul %10, %33, %cst_33 {dimension_numbers = #tpu.dot_dimension_numbers<[1], [0], [0], [1], [0, 0, 1, 1], [], []>} : vector<4x85xbf16>, vector<85x85xbf16>, vector<4x85xf32> -> vector<4x85xf32>
    %c8 = arith.constant 8 : index
    %c0_34 = arith.constant 0 : index
    %c0_35 = arith.constant 0 : index
    %35 = vector.load %arg3[%c8, %c0_34, %c0_35] : memref<9x85x85xbf16, #tpu.memory_space<vmem>>, vector<1x85x85xbf16>
    %36 = vector.shape_cast %35 : vector<1x85x85xbf16> to vector<85x85xbf16>
    %cst_36 = arith.constant dense<0.000000e+00> : vector<4x85xf32>
    %37 = tpu.matmul %10, %36, %cst_36 {dimension_numbers = #tpu.dot_dimension_numbers<[1], [0], [0], [1], [0, 0, 1, 1], [], []>} : vector<4x85xbf16>, vector<85x85xbf16>, vector<4x85xf32> -> vector<4x85xf32>
    %38 = tpu.concatenate %13, %16, %19, %22, %25, %28, %31, %34, %37 in 0 : vector<4x85xf32>, vector<4x85xf32>, vector<4x85xf32>, vector<4x85xf32>, vector<4x85xf32>, vector<4x85xf32>, vector<4x85xf32>, vector<4x85xf32>, vector<4x85xf32> -> vector<36x85xf32>
    %39 = arith.truncf %38 : vector<36x85xf32> to vector<36x85xbf16>
    %40 = tpu.iota {dimensions = array<i32: 1>} : vector<1x85xi32>
    %cst_37 = arith.constant 0.000000e+00 : f32
    %41 = vector.broadcast %cst_37 : f32 to vector<4x85xf32>
    %c0_38 = arith.constant 0 : index
    %c0_39 = arith.constant 0 : index
    %c0_40 = arith.constant 0 : index
    %42 = vector.load %arg4[%c0_38, %c0_39, %c0_40] : memref<4x4x36xbf16, #tpu.memory_space<vmem>>, vector<1x4x36xbf16>
    %43 = vector.shape_cast %42 : vector<1x4x36xbf16> to vector<4x36xbf16>
    %cst_41 = arith.constant dense<0.000000e+00> : vector<4x85xf32>
    %44 = tpu.matmul %43, %39, %cst_41 {dimension_numbers = #tpu.dot_dimension_numbers<[1], [0], [0], [1], [0, 0, 1, 1], [], []>} : vector<4x36xbf16>, vector<36x85xbf16>, vector<4x85xf32> -> vector<4x85xf32>
    %c0_i32 = arith.constant 0 : i32
    %45 = vector.broadcast %c0_i32 : i32 to vector<1x85xi32>
    %46 = arith.cmpi sge, %40, %45 : vector<1x85xi32>
    %c1_i32 = arith.constant 1 : i32
    %47 = vector.broadcast %c1_i32 : i32 to vector<1x85xi32>
    %48 = arith.cmpi slt, %40, %47 : vector<1x85xi32>
    %49 = arith.andi %46, %48 : vector<1x85xi1>
    %cst_42 = arith.constant 0.000000e+00 : f32
    %50 = vector.shape_cast %49 : vector<1x85xi1> to vector<1x85xi1>
    %51 = vector.broadcast %50 : vector<1x85xi1> to vector<4x85xi1>
    %52 = vector.broadcast %cst_42 : f32 to vector<4x85xf32>
    %53 = arith.select %51, %44, %52 : vector<4x85xi1>, vector<4x85xf32>
    %54 = arith.addf %41, %53 : vector<4x85xf32>
    %c1_43 = arith.constant 1 : index
    %c0_44 = arith.constant 0 : index
    %c0_45 = arith.constant 0 : index
    %55 = vector.load %arg4[%c1_43, %c0_44, %c0_45] : memref<4x4x36xbf16, #tpu.memory_space<vmem>>, vector<1x4x36xbf16>
    %56 = vector.shape_cast %55 : vector<1x4x36xbf16> to vector<4x36xbf16>
    %cst_46 = arith.constant dense<0.000000e+00> : vector<4x85xf32>
    %57 = tpu.matmul %56, %39, %cst_46 {dimension_numbers = #tpu.dot_dimension_numbers<[1], [0], [0], [1], [0, 0, 1, 1], [], []>} : vector<4x36xbf16>, vector<36x85xbf16>, vector<4x85xf32> -> vector<4x85xf32>
    %c1_i32_47 = arith.constant 1 : i32
    %58 = vector.broadcast %c1_i32_47 : i32 to vector<1x85xi32>
    %59 = arith.cmpi sge, %40, %58 : vector<1x85xi32>
    %c5_i32 = arith.constant 5 : i32
    %60 = vector.broadcast %c5_i32 : i32 to vector<1x85xi32>
    %61 = arith.cmpi slt, %40, %60 : vector<1x85xi32>
    %62 = arith.andi %59, %61 : vector<1x85xi1>
    %cst_48 = arith.constant 0.000000e+00 : f32
    %63 = vector.shape_cast %62 : vector<1x85xi1> to vector<1x85xi1>
    %64 = vector.broadcast %63 : vector<1x85xi1> to vector<4x85xi1>
    %65 = vector.broadcast %cst_48 : f32 to vector<4x85xf32>
    %66 = arith.select %64, %57, %65 : vector<4x85xi1>, vector<4x85xf32>
    %67 = arith.addf %54, %66 : vector<4x85xf32>
    %c2_49 = arith.constant 2 : index
    %c0_50 = arith.constant 0 : index
    %c0_51 = arith.constant 0 : index
    %68 = vector.load %arg4[%c2_49, %c0_50, %c0_51] : memref<4x4x36xbf16, #tpu.memory_space<vmem>>, vector<1x4x36xbf16>
    %69 = vector.shape_cast %68 : vector<1x4x36xbf16> to vector<4x36xbf16>
    %cst_52 = arith.constant dense<0.000000e+00> : vector<4x85xf32>
    %70 = tpu.matmul %69, %39, %cst_52 {dimension_numbers = #tpu.dot_dimension_numbers<[1], [0], [0], [1], [0, 0, 1, 1], [], []>} : vector<4x36xbf16>, vector<36x85xbf16>, vector<4x85xf32> -> vector<4x85xf32>
    %c5_i32_53 = arith.constant 5 : i32
    %71 = vector.broadcast %c5_i32_53 : i32 to vector<1x85xi32>
    %72 = arith.cmpi sge, %40, %71 : vector<1x85xi32>
    %c21_i32 = arith.constant 21 : i32
    %73 = vector.broadcast %c21_i32 : i32 to vector<1x85xi32>
    %74 = arith.cmpi slt, %40, %73 : vector<1x85xi32>
    %75 = arith.andi %72, %74 : vector<1x85xi1>
    %cst_54 = arith.constant 0.000000e+00 : f32
    %76 = vector.shape_cast %75 : vector<1x85xi1> to vector<1x85xi1>
    %77 = vector.broadcast %76 : vector<1x85xi1> to vector<4x85xi1>
    %78 = vector.broadcast %cst_54 : f32 to vector<4x85xf32>
    %79 = arith.select %77, %70, %78 : vector<4x85xi1>, vector<4x85xf32>
    %80 = arith.addf %67, %79 : vector<4x85xf32>
    %c3_55 = arith.constant 3 : index
    %c0_56 = arith.constant 0 : index
    %c0_57 = arith.constant 0 : index
    %81 = vector.load %arg4[%c3_55, %c0_56, %c0_57] : memref<4x4x36xbf16, #tpu.memory_space<vmem>>, vector<1x4x36xbf16>
    %82 = vector.shape_cast %81 : vector<1x4x36xbf16> to vector<4x36xbf16>
    %cst_58 = arith.constant dense<0.000000e+00> : vector<4x85xf32>
    %83 = tpu.matmul %82, %39, %cst_58 {dimension_numbers = #tpu.dot_dimension_numbers<[1], [0], [0], [1], [0, 0, 1, 1], [], []>} : vector<4x36xbf16>, vector<36x85xbf16>, vector<4x85xf32> -> vector<4x85xf32>
    %c21_i32_59 = arith.constant 21 : i32
    %84 = vector.broadcast %c21_i32_59 : i32 to vector<1x85xi32>
    %85 = arith.cmpi sge, %40, %84 : vector<1x85xi32>
    %c85_i32 = arith.constant 85 : i32
    %86 = vector.broadcast %c85_i32 : i32 to vector<1x85xi32>
    %87 = arith.cmpi slt, %40, %86 : vector<1x85xi32>
    %88 = arith.andi %85, %87 : vector<1x85xi1>
    %cst_60 = arith.constant 0.000000e+00 : f32
    %89 = vector.shape_cast %88 : vector<1x85xi1> to vector<1x85xi1>
    %90 = vector.broadcast %89 : vector<1x85xi1> to vector<4x85xi1>
    %91 = vector.broadcast %cst_60 : f32 to vector<4x85xf32>
    %92 = arith.select %90, %83, %91 : vector<4x85xi1>, vector<4x85xf32>
    %93 = arith.addf %80, %92 : vector<4x85xf32>
    %94 = arith.truncf %93 : vector<4x85xf32> to vector<4x85xbf16>
    %c0_61 = arith.constant 0 : index
    %c0_62 = arith.constant 0 : index
    %95 = vector.load %arg6[%c0_61, %c0_62] : memref<85x256xbf16, #tpu.memory_space<vmem>>, vector<85x256xbf16>
    %cst_63 = arith.constant dense<0.000000e+00> : vector<4x256xf32>
    %96 = tpu.matmul %94, %95, %cst_63 {dimension_numbers = #tpu.dot_dimension_numbers<[1], [0], [0], [1], [0, 0, 1, 1], [], []>} : vector<4x85xbf16>, vector<85x256xbf16>, vector<4x256xf32> -> vector<4x256xf32>
    %97 = arith.addf %6, %96 : vector<4x256xf32>
    %c0_64 = arith.constant 0 : index
    %c0_65 = arith.constant 0 : index
    %c0_66 = arith.constant 0 : index
    %98 = vector.load %arg8[%c0_64, %c0_65, %c0_66] : memref<1x4x256xf32, #tpu.memory_space<vmem>>, vector<1x4x256xf32>
    %99 = vector.shape_cast %98 : vector<1x4x256xf32> to vector<4x256xf32>
    %100 = vector.shape_cast %97 : vector<4x256xf32> to vector<1x4x256xf32>
    tpu.vector_store %arg8[%c0_64, %c0_65, %c0_66], %100 {strides = array<i32>} : memref<1x4x256xf32, #tpu.memory_space<vmem>>, vector<1x4x256xf32>,
    return
  }
  func.func @transform_0(%arg0: i32) -> (i32, i32, i32) {
    %c0_i32 = arith.constant 0 : i32
    %c0_i32_0 = arith.constant 0 : i32
    %c0_i32_1 = arith.constant 0 : i32
    return %arg0, %c0_i32, %c0_i32_0 : i32, i32, i32
  }
  func.func @transform_1(%arg0: i32) -> (i32, i32) {
    %c0_i32 = arith.constant 0 : i32
    %c0_i32_0 = arith.constant 0 : i32
    %c0_i32_1 = arith.constant 0 : i32
    return %c0_i32, %c0_i32_0 : i32, i32
  }
  func.func @transform_2(%arg0: i32) -> (i32, i32, i32) {
    %c0_i32 = arith.constant 0 : i32
    %c0_i32_0 = arith.constant 0 : i32
    %c0_i32_1 = arith.constant 0 : i32
    %c0_i32_2 = arith.constant 0 : i32
    return %c0_i32, %c0_i32_0, %c0_i32_1 : i32, i32, i32
  }
  func.func @transform_3(%arg0: i32) -> (i32, i32, i32) {
    %c0_i32 = arith.constant 0 : i32
    %c0_i32_0 = arith.constant 0 : i32
    %c0_i32_1 = arith.constant 0 : i32
    %c0_i32_2 = arith.constant 0 : i32
    return %c0_i32, %c0_i32_0, %c0_i32_1 : i32, i32, i32
  }
  func.func @transform_4(%arg0: i32) -> (i32, i32) {
    %c0_i32 = arith.constant 0 : i32
    %c0_i32_0 = arith.constant 0 : i32
    %c0_i32_1 = arith.constant 0 : i32
    return %c0_i32, %c0_i32_0 : i32, i32
  }
  func.func @transform_5(%arg0: i32) -> (i32, i32) {
    %c0_i32 = arith.constant 0 : i32
    %c0_i32_0 = arith.constant 0 : i32
    %c0_i32_1 = arith.constant 0 : i32
    return %c0_i32, %c0_i32_0 : i32, i32
  }
  func.func @transform_6(%arg0: i32) -> (i32, i32) {
    %c0_i32 = arith.constant 0 : i32
    %c0_i32_0 = arith.constant 0 : i32
    %c0_i32_1 = arith.constant 0 : i32
    return %c0_i32, %c0_i32_0 : i32, i32
  }
  func.func @transform_7(%arg0: i32) -> (i32, i32, i32) {
    %c0_i32 = arith.constant 0 : i32
    %c0_i32_0 = arith.constant 0 : i32
    %c0_i32_1 = arith.constant 0 : i32
    return %arg0, %c0_i32, %c0_i32_0 : i32, i32, i32
  }
}

</mosaic_0001>

<bundles_post_ra>
// kernel: tpu_custom_call.1
= control target key start
LH: loop header
LB: loop body
LE: loop exit
PB: predicated region body
PF: predicated region fallthrough
CT: control target
= control target key end

     0   :  { %12 = vsyncpa [#allocation3], 0  ;;  %s2869_s0 = inlined_call_operand.vmem [shape: f32[2,4,256], index: 0, kind: input, shape index: {}]   ;;  %s2870_s1 = inlined_call_operand.vmem [shape: bf16[256,85], index: 1, kind: input, shape index: {}]   ;;  %s2871_s2 = inlined_call_operand.hbm [shape: bf16[9,85,85], index: 2, kind: input, shape index: {}]   ;;  %s2872_s3 = inlined_call_operand.vmem [shape: bf16[4,4,36], index: 3, kind: input, shape index: {}]   ;;  %s2873_s4 = inlined_call_operand.vmem [shape: f32[4,4], index: 4, kind: input, shape index: {}]   ;;  %s2874_s5 = inlined_call_operand.vmem [shape: bf16[85,256], index: 5, kind: input, shape index: {}]   ;;  %s2875_s6 = inlined_call_operand.vmem [shape: f32[4,1], index: 6, kind: input, shape index: {}]   ;;  %s2876_s7 = inlined_call_operand.hbm [shape: f32[2,4,256], index: 7, kind: output, shape index: {}]  }
   0x1   :  { %13 = vsyncpa [#allocation4], 0 }
   0x2   :  { %15 = vsyncpa [#allocation4 + $0x1], 0  ;;  %s2488_s24 = smov 0   ;;  %s2490_s25 = smov 0  }
   0x3   :  { %s2492_s26 = smov 0   ;;  %s2494_s27 = smov 0  }
   0x4 LB: > { %s2509_s28 = sadd.s32 4294967295, %s2438_s27   ;;  %s1796_s29 = sadd.s32 4294967294, %s2438_s27   ;;  %s2438_s27 = sphi %s2494_s27, %s2892_s27   ;;  %s2434_s26 = sphi %s2492_s26, %s2891_s26   ;;  %s2430_s25 = sphi %s2490_s25, %s2890_s25   ;;  %s2426_s24 = sphi %s2488_s24, %s2889_s24  }
   0x5   : > { %s2513_s30 = sadd.s32 1, %s2438_s27   ;;  %s180_s8 = sadd.s32 1, %s2434_s26 }
   0x6   : > { %s177_s9 = ssub.s32 %s2438_s27, %s2513_s30  ;;  %p190_p0 = scmp.ne.s32.totalorder %s2434_s26, %s2430_s25 }
   0x7   : > { %p178_p1 = scmp.eq.s32.totalorder %s177_s9, 0  ;;  %p191_p2 = scmp.eq.s32.totalorder %s2509_s28, 1 }
   0x8   : > { %p196_p3 = scmp.ne.s32.totalorder %s2430_s25, %s2426_s24  ;;  %p197_p4 = scmp.eq.s32.totalorder %s1796_s29, 1 }
   0x9   : > { %s2524_s10 = scalar_select %p178_p1, %s2434_s26, %s180_s8  }
   0xa   : > { %p2526_p5 = por %p191_p2, %p190_p0  ;;  %p2530_p6 = por %p197_p4, %p196_p3 }
   0xb   : > { %p1797_p7 = scmp.ge.s32.totalorder %s2438_s27, 1  ;;  %p204_p8 = scmp.lt.s32.totalorder %s2438_s27, 3 }
   0xc   : > { %s2880_s11 = scalar_select %p2526_p5, 1, 0 }
   0xd   : > { %s2881_s12 = scalar_select %p2530_p6, 1, 0 }
   0xe   : > { %p2877_p9 = scmp.eq.s32.totalorder %s2509_s28, 0  ;;  %p2537_p10 = pnand %p1797_p7, %p204_p8 }
   0xf   : > { %s2440_s14 = smov [#allocation2]   ;;  %s2344_s19 = scalar_lea.hbm %s2871_s2, 6336 }
  0x10   : > { %s2882_s13 = scalar_select %p2537_p10, 1, 0 }
  0x11   : > { %s219_s15 = sshll.u32 %s2440_s14, 4  ;;  %p2205_p11 = pneg %p2537_p10  ;;  %s220_s15 = int_to_ptr.vmem [resolvable:$true] %s219_s15 }
  0x12   : > { %p2345_p13 = scmp.ne.s32.totalorder %s2871_s2, %s2344_s19  ;;  %p2351_p3 = scmp.lt.u32.totalorder %s2344_s19, %s2871_s2 }
  0x13   : > { %p2545_p12 = pnand %p2877_p9, %p2205_p11 }
  0x15   : > { %p2346_p0 = pneg %p2545_p12 }
  0x17   : > { %p2347_p1 = pnand %p2346_p0, %p2345_p13 }
  0x19   : > { %p2348_p2 = pneg %p2347_p1 }
  0x1b   : > { %p2353_p4 = pnand %p2351_p3, %p2348_p2 }
  0x1d   : > { %2356 = shalt.err (!%p2353_p4)
}
  0x1e   : > { %s2357_s29 = scalar_lea.vmem %s220_s15, 6336  ;;  %p2365_p9 = scmp.lt.s32.totalorder %s220_s15, %s220_s15 }
  0x1f   : > { %p2358_p7 = scmp.ne.s32.totalorder %s220_s15, %s2357_s29  ;;  %p2366_p6 = scmp.lt.s32.totalorder %s2357_s29, %s2357_s29 }
  0x21   : > { %p2360_p8 = pnand %p2358_p7, %p2346_p0  ;;  %p2367_p5 = por %p2366_p6, %p2365_p9 }
  0x23   : > { %p2361_p11 = pneg %p2360_p8 }
  0x25   : > { %p2368_p10 = pnand %p2367_p5, %p2361_p11 }
  0x27   : > { %2371 = shalt.err (!%p2368_p10)
}
  0x28   : > { %s2441_s8 = smov 64   ;;  %s2442_s9 = smov 4  }
  0x29   : > { %2208 = dma.hbm_to_vmem [thread:$0]  (!%p2545_p12), %s2871_s2, 6336, %s220_s15, [#allocation3], %s2441_s8, %s2441_s8, %s2442_s9  }
  0x2a   : > { %p2884_p13 = scmp.ne.s32.totalorder %s2882_s13, 0 }
  0x2b   : > { %p2885_p1 = scmp.eq.s32.totalorder (!%p2884_p13), %s2509_s28, 0 }
  0x2c   : > { %255 = sbr.rel (%p2884_p13) target bundleno = 1094 (0x446), region = 48 }
  0x33   : > { %2417 = dma.done.wait (%p2885_p1), [#allocation3], 6336   ;;  %p2886_p0 = pmov %p2885_p1 }
  0x34   : > { %v2443_v0 = vmov 0.0   ;;  %v2256_v1 = vld [vmem:[%s2870_s1 + $0x40] sm:$0xff]   ;;  %v2258_v3 = vld [vmem:[%s2870_s1 + $0x48] sm:$0xff]   ;;  %p287_p5 = scmp.lt.s32.totalorder %s2509_s28, 1  ;;  %v2260_v5 = vld [vmem:[%s2870_s1 + $0x50] sm:$0xff]   ;;  %vm307_vm0 = vcmask 1043456  }
  0x35   : > { %2419 = vsyncadd (%p2886_p0), [#allocation3], 4294960960  ;;  %376 = vmatprep.mubr.f32.mxu0 %v2443_v0  ;;  %v2257_v2 = vld [vmem:[%s2870_s1] sm:$0xff]   ;;  %1914 = vmatprep.subr.bf16.mxu1 %v2256_v1  ;;  %v2259_v4 = vld [vmem:[%s2870_s1 + $0x8] sm:$0xff]   ;;  %vm303_vm1 = vcmask 31744   ;;  %vm603_vm2 = vcmask 1041408  }
  0x36   : > { %1915 = vmatpush3.bf16.msra.mxu1 %v2257_v2  ;;  %s288_s8 = scalar_select %p287_p5, %s2509_s28, 1  ;;  %v2261_v6 = vld [vmem:[%s2870_s1 + $0x10] sm:$0xff]   ;;  %v2262_v7 = vld [vmem:[%s2870_s1 + $0x58] sm:$0xff]   ;;  %v2264_v9 = vld [vmem:[%s2870_s1 + $0x60] sm:$0xff]   ;;  %vm604_vm3 = vcmask 1042432   ;;  %v2444_v33 = vmov 65535  }
  0x37   : > { %1916 = vmatprep.subr.bf16.mxu1 %v2258_v3  ;;  %v2263_v8 = vld [vmem:[%s2870_s1 + $0x18] sm:$0xff]   ;;  %v2265_v10 = vld [vmem:[%s2870_s1 + $0x20] sm:$0xff]   ;;  %v2266_v11 = vld [vmem:[%s2870_s1 + $0x68] sm:$0xff]   ;;  %v605_v34 = vsel %vm603_vm2, 4294967295, %v2444_v33  ;;  %vm2445_vm4 = vmmov 0   ;;  %v2446_v39 = vmov 0  }
  0x38   : > { %s1912_s16 = sshll.u32 %s288_s8, 3  ;;  %v2267_v13 = vld [vmem:[%s2870_s1 + $0x28] sm:$0xff]   ;;  %v294_v15 = vld [vmem:[%s2873_s4] sm:$0xf]  ;;  %v2268_v18 = vld [vmem:[%s2870_s1 + $0x70] sm:$0xff]   ;;  %v2643_v35 = vsel %vm604_vm3, %v605_v34, 0  ;;  %2255 = vset.pattern.permute.xlu0 %v2446_v39 }
  0x39   : > { %s291_s23 = scalar_lea.vmem %s2869_s0, %s1912_s16  ;;  %v2273_v17 = vld [vmem:[#allocation2] sm:$0xff]   ;;  %v2269_v19 = vld [vmem:[%s2870_s1 + $0x30] sm:$0xff]   ;;  %v2275_v20 = vld [vmem:[#allocation2 + $0x8] sm:$0xff]   ;;  %vm599_vm5 = vcmask 695296   ;;  %vm1376_vm6 = vcmask 293888   ;;  %s284_s19 = sand.u32 1, %s2430_s25  }
  0x3a   : > { %1917 = vmatpush3.bf16.msra.mxu1 %v2259_v4  ;;  %v293_v12 = vld [vmem:[%s291_s23] sm:$0xff]  ;;  %v2270_v21 = vld [vmem:[%s2870_s1 + $0x78] sm:$0xff]   ;;  %v2277_v23 = vld [vmem:[#allocation2 + $0x10] sm:$0xff]   ;;  %s1802_s16 = sshll.u32 %s284_s19, 3  ;;  %s1913_s15 = sshll.u32 %s2509_s28, 7 }
  0x3b   : > { %1918 = vmatprep.subr.bf16.mxu1 %v2260_v5  ;;  %v302_v14 = vcombine.high %v293_v12, %v293_v12  ;;  %v2271_v22 = vld [vmem:[%s2870_s1 + $0x38] sm:$0xff]   ;;  %v384_v26 = vpack.c.bf16 %v293_v12, %v293_v12  ;;  %v2276_v27 = vld [vmem:[#allocation2 + $0x60] sm:$0xff]   ;;  %v2278_v29 = vld [vmem:[#allocation2 + $0x68] sm:$0xff]   ;;  %s286_s13 = scalar_lea.vmem [#allocation5], %s1802_s16  ;;  %s2827_s23 = scalar_lea.hbm %s2876_s7, %s1913_s15 }
  0x3c   : > { %v2274_v24 = vld [vmem:[#allocation2 + $0x58] sm:$0xff]   ;;  %v2281_v28 = vld [vmem:[#allocation2 + $0x20] sm:$0xff]   ;;  %v2280_v30 = vld [vmem:[#allocation2 + $0x70] sm:$0xff]   ;;  %s1725_s20 = sshll.u32 %s286_s13, 4  ;;  %s1711_s29 = scalar_lea.sflag [#allocation4], %s284_s19  ;;  %s2829_s20 = int_to_ptr.vmem [resolvable:$true] %s1725_s20 }
  0x3d   : > { %v385_v16 = vpack.c.bf16 %v302_v14, %v302_v14  ;;  %1805 = vmatprep.subr.msk.mxu0 %vm307_vm0, %v302_v14  ;;  %v2279_v25 = vld [vmem:[#allocation2 + $0x18] sm:$0xff]   ;;  %v2283_v32 = vld [vmem:[#allocation2 + $0x28] ss:$0 sps:$4 sm:$0x77]   ;;  %v295_v40 = vld [vmem:[%s2875_s6] sm:$0xf] }
  0x3e   : > { %1919 = vmatpush3.bf16.msra.mxu1 %v2261_v6  ;;  %1806 = vmatpush1.msk.msra.mxu0 %vm307_vm0, %v293_v12  ;;  %v2282_v31 = vld [vmem:[#allocation2 + $0x78] sm:$0xff]   ;;  %v2284_v36 = vld [vmem:[#allocation2 + $0x80] ss:$0 sps:$4 sm:$0x77]   ;;  %v608_v37 = vand.u32 %v2283_v32, %v2643_v35  ;;  %v2285_v48 = vld [vmem:[#allocation2 + $0x2c] sm:$0xff]   ;;  %s2372_s9 = scalar_lea.vmem %s2829_s20, 128 }
  0x3f   : > { %1920 = vmatprep.subr.bf16.mxu1 %v2262_v7  ;;  %546 = vmatprep.mubr.bf16.mxu1 %v385_v16  ;;  %v784_v38 = vand.u32 %v2284_v36, %v2643_v35  ;;  %v2286_v49 = vld [vmem:[#allocation2 + $0xb0] sm:$0xff]   ;;  %v2288_v52 = vld [vmem:[#allocation2 + $0xb8] sm:$0xff]   ;;  %v2290_v54 = vld [vmem:[#allocation2 + $0xc0] sm:$0xff]   ;;  %p2373_p6 = scmp.ne.s32.totalorder %s2829_s20, %s2372_s9  ;;  %p2887_p9 = scmp.ne.s32.totalorder %s2880_s11, 0 }
  0x40   : > { %1807 = vmatmul.mubr.msk.f32.vlgmr.msra.gmra.mrb[0].mxu0 %vm303_vm1, %v294_v15  ;;  %2015 = vmatprep.subr.bf16.mxu0 %v2443_v0  ;;  %v2287_v51 = vld [vmem:[#allocation2 + $0x34] sm:$0xff]   ;;  %v2289_v53 = vld [vmem:[#allocation2 + $0x3c] sm:$0xff]   ;;  %v2291_v55 = vld [vmem:[#allocation2 + $0x44] sm:$0xff]   ;;  %s2447_s28 = smov [#allocation5]  }
  0x41   : > { %2016 = vmatpush3.bf16.msra.mxu0 %v2273_v17  ;;  %2027 = vmatprep.mubr.msk.bf16.mxu0 %vm2445_vm4, %v2443_v0  ;;  %v2292_v56 = vld [vmem:[#allocation2 + $0xc8] sm:$0xff]   ;;  %v2294_v58 = vld [vmem:[#allocation2 + $0xd0] sm:$0xff]   ;;  %v2296_v60 = vld [vmem:[#allocation2 + $0xd8] ss:$0 sps:$4 sm:$0x77]   ;;  %p2374_p10 = pnand %p2373_p6, %p2887_p9  ;;  %s2376_s8 = sshll.u32 %s2447_s28, 4  ;;  %s2377_s8 = int_to_ptr.vmem [resolvable:$false] %s2376_s8 }
  0x42   : > { %1921 = vmatpush3.bf16.msra.mxu1 %v2263_v8  ;;  %2017 = vmatprep.subr.bf16.mxu0 %v2443_v0  ;;  %v2293_v57 = vld [vmem:[#allocation2 + $0x4c] sm:$0xff]   ;;  %v2295_v59 = vld [vmem:[#allocation2 + $0x54] ss:$0 sps:$4 sm:$0x77]   ;;  %v960_v62 = vand.u32 %v2296_v60, %v2643_v35  ;;  %v2297_v63 = vld [vmem:[#allocation2 + $0x84] sm:$0xff]   ;;  %s2378_s14 = scalar_lea.vmem %s2377_s8, 256  ;;  %p2379_p2 = scmp.lt.s32.totalorder %s2829_s20, %s2377_s8 }
  0x43   : > { %1922 = vmatprep.subr.bf16.mxu1 %v2264_v9  ;;  %298 = vperm.xlu0 %2255, %v295_v40   ;;  %v696_v61 = vand.u32 %v2295_v59, %v2643_v35  ;;  %v2298_v1 = vld [vmem:[#allocation2 + $0x108] sm:$0xff]   ;;  %v2300_v3 = vld [vmem:[#allocation2 + $0x110] sm:$0xff]   ;;  %v2302_v5 = vld [vmem:[#allocation2 + $0x118] sm:$0xff]   ;;  %p2375_p12 = pneg %p2374_p10  ;;  %p2380_p3 = scmp.lt.s32.totalorder %s2378_s14, %s2372_s9 }
  0x44   : > { %v2299_v2 = vld [vmem:[#allocation2 + $0x8c] sm:$0xff]   ;;  %v2301_v4 = vld [vmem:[#allocation2 + $0x94] sm:$0xff]   ;;  %v2303_v6 = vld [vmem:[#allocation2 + $0x9c] sm:$0xff]  }
  0x45   : > { %2018 = vmatpush3.bf16.msra.mxu0 %v2275_v20  ;;  %v2304_v7 = vld [vmem:[#allocation2 + $0x120] sm:$0xff]   ;;  %v2306_v9 = vld [vmem:[#allocation2 + $0x128] sm:$0xff]   ;;  %v2315_v20 = vld [vmem:[#allocation2 + $0xf4] sm:$0xff]   ;;  %p2381_p4 = por %p2380_p3, %p2379_p2 }
  0x46   : > { %1923 = vmatpush3.bf16.msra.mxu1 %v2265_v10  ;;  %2019 = vmatprep.subr.bf16.mxu0 %v2443_v0  ;;  %v2305_v8 = vld [vmem:[#allocation2 + $0xa4] sm:$0xff]   ;;  %v2307_v10 = vld [vmem:[#allocation2 + $0xac] ss:$0 sps:$4 sm:$0x77]   ;;  %v2309_v14 = vld [vmem:[#allocation2 + $0xdc] sm:$0xff]  }
  0x47   : > { %1924 = vmatprep.subr.bf16.mxu1 %v2266_v11  ;;  %v2308_v11 = vld [vmem:[#allocation2 + $0x130] ss:$0 sps:$4 sm:$0x77]   ;;  %v872_v12 = vand.u32 %v2307_v10, %v2643_v35  ;;  %v2310_v15 = vld [vmem:[#allocation2 + $0x160] sm:$0xff]   ;;  %v2312_v17 = vld [vmem:[#allocation2 + $0x168] sm:$0xff]   ;;  %p2382_p7 = pnand %p2381_p4, %p2375_p12 }
  0x48   : > { %v2311_v16 = vld [vmem:[#allocation2 + $0xe4] sm:$0xff]   ;;  %v2325_v32 = vld [vmem:[#allocation2 + $0x154] sm:$0xff]   ;;  %v2326_v33 = vld [vmem:[#allocation2 + $0x15c] ss:$0 sps:$4 sm:$0x77]  }
  0x49   : > { %2020 = vmatpush3.bf16.msra.mxu0 %v2277_v23  ;;  %v2318_v23 = vld [vmem:[#allocation2 + $0x180] sm:$0xff]   ;;  %v1224_v34 = vand.u32 %v2326_v33, %v2643_v35  ;;  %v2338_v33 = vld [vmem:[%s2874_s5 + $0x34] ss:$8 sps:$4 sm:$0xff]  }
  0x4a   : > { %1925 = vmatpush3.bf16.msra.mxu1 %v2267_v13  ;;  %2021 = vmatprep.subr.bf16.mxu0 %v2443_v0  ;;  %v1136_v13 = vand.u32 %v2308_v11, %v2643_v35 }
  0x4b   : > { %1926 = vmatprep.subr.bf16.mxu1 %v2268_v18  ;;  %v2313_v18 = vld [vmem:[#allocation2 + $0xec] sm:$0xff]  }
  0x4d   : > { %2022 = vmatpush3.bf16.msra.mxu0 %v2279_v25  ;;  %v2320_v25 = vld [vmem:[#allocation2 + $0x188] ss:$0 sps:$4 sm:$0x77]  }
  0x4e   : > { %1927 = vmatpush3.bf16.msra.mxu1 %v2269_v19  ;;  %2023 = vmatprep.subr.bf16.mxu0 %v2443_v0  ;;  %v2314_v19 = vld [vmem:[#allocation2 + $0x170] sm:$0xff]  }
  0x4f   : > { %1928 = vmatprep.subr.bf16.mxu1 %v2270_v21  ;;  %v2316_v21 = vld [vmem:[#allocation2 + $0x178] sm:$0xff]  }
  0x51   : > { %2024 = vmatpush3.bf16.msra.mxu0 %v2281_v28  ;;  %v2321_v28 = vld [vmem:[#allocation2 + $0x134] sm:$0xff]  }
  0x52   : > { %1929 = vmatpush3.bf16.msra.mxu1 %v2271_v22  ;;  %2025 = vmatprep.subr.bf16.mxu0 %v2443_v0  ;;  %v2317_v22 = vld [vmem:[#allocation2 + $0xfc] sm:$0xff]  }
  0x53   : > { %2047 = vmatprep.subr.bf16.mxu1 %v2443_v0 }
  0x55   : > { %547 = vmatmul.mubr.bf16.vlgmr.msra.gmra.mrb[0].mxu1 %v384_v26  ;;  %2026 = vmatpush3.bf16.msra.mxu0 %v608_v37 }
  0x56   : > { %2048 = vmatpush3.bf16.msra.mxu1 %v2274_v24  ;;  %2031 = vmatprep.subr.bf16.mxu0 %v2443_v0  ;;  %v2319_v24 = vld [vmem:[#allocation2 + $0x104] ss:$0 sps:$4 sm:$0x77]  }
  0x57   : > { %2049 = vmatprep.subr.bf16.mxu1 %v2443_v0  ;;  %2059 = vmatprep.mubr.msk.bf16.mxu1 %vm2445_vm4, %v2443_v0  ;;  %v1048_v26 = vand.u32 %v2319_v24, %v2643_v35  ;;  %v1375_v24 = vld [vmem:[%s2872_s3] sm:$0x3] }
  0x5a   : > { %2050 = vmatpush3.bf16.msra.mxu1 %v2276_v27  ;;  %v1312_v27 = vand.u32 %v2320_v25, %v2643_v35  ;;  %v1890_v25 = vld [vmem:[%s2872_s3 + $0x4] sm:$0x3] }
  0x5b   : > { %2051 = vmatprep.subr.bf16.mxu1 %v2443_v0 }
  0x5e   : > { %2052 = vmatpush3.bf16.msra.mxu1 %v2278_v29  ;;  %v2322_v29 = vld [vmem:[#allocation2 + $0x13c] sm:$0xff]  }
  0x5f   : > { %2053 = vmatprep.subr.bf16.mxu1 %v2443_v0 }
  0x62   : > { %2054 = vmatpush3.bf16.msra.mxu1 %v2280_v30  ;;  %v2323_v30 = vld [vmem:[#allocation2 + $0x144] sm:$0xff]  }
  0x63   : > { %2055 = vmatprep.subr.bf16.mxu1 %v2443_v0 }
  0x66   : > { %2056 = vmatpush3.bf16.msra.mxu1 %v2282_v31  ;;  %v2324_v31 = vld [vmem:[#allocation2 + $0x14c] sm:$0xff]  }
  0x67   : > { %2057 = vmatprep.subr.bf16.mxu1 %v2443_v0 }
  0x6a   : > { %2058 = vmatpush3.bf16.msra.mxu1 %v784_v38 }
  0x6b   : > { %2079 = vmatprep.subr.bf16.mxu1 %v2443_v0 }
 0x113   : > { %v2657_v41 = vpop.f32.mrb[0].mxu0 }
 0x114   : > { %v2659_v42 = vpop.f32.mrb[1].mxu0 }
 0x128   : > { %v1930_v43 = vpop.f32.mrb[0].mxu1 }
 0x129   : > { %v1931_v44 = vpop.f32.mrb[1].mxu1 }
 0x12a   : > { %v1932_v45 = vadd.f32 %v1931_v44, %v1930_v43  ;;  %v1933_v46 = vpop.f32.mrb[2].mxu1 }
 0x12b   : > { %v1934_v47 = vpop.f32.mrb[3].mxu1 }
 0x12c   : > { %v2661_v50 = vpack.c.bf16 %v1932_v45, %v1932_v45 }
 0x12e   : > { %2028 = vmatmul.mubr.msk.bf16.vlgmr.msra.gmra.mrb[4].mxu0 %vm599_vm5, %v2661_v50  ;;  %2060 = vmatmul.mubr.msk.bf16.vlgmr.msra.gmra.mrb[4].mxu1 %vm599_vm5, %v2661_v50 }
 0x12f   : > { %2032 = vmatpush3.bf16.msra.mxu0 %v2285_v48  ;;  %2080 = vmatpush3.bf16.msra.mxu1 %v2286_v49 }
 0x130   : > { %2033 = vmatprep.subr.bf16.mxu0 %v2443_v0  ;;  %2081 = vmatprep.subr.bf16.mxu1 %v2443_v0 }
 0x131   : > { %2043 = vmatprep.mubr.msk.bf16.mxu0 %vm2445_vm4, %v2443_v0  ;;  %2091 = vmatprep.mubr.msk.bf16.mxu1 %vm2445_vm4, %v2443_v0 }
 0x133   : > { %2034 = vmatpush3.bf16.msra.mxu0 %v2287_v51  ;;  %2082 = vmatpush3.bf16.msra.mxu1 %v2288_v52 }
 0x134   : > { %2035 = vmatprep.subr.bf16.mxu0 %v2443_v0  ;;  %2083 = vmatprep.subr.bf16.mxu1 %v2443_v0 }
 0x137   : > { %2036 = vmatpush3.bf16.msra.mxu0 %v2289_v53  ;;  %2084 = vmatpush3.bf16.msra.mxu1 %v2290_v54 }
 0x138   : > { %2037 = vmatprep.subr.bf16.mxu0 %v2443_v0  ;;  %2085 = vmatprep.subr.bf16.mxu1 %v2443_v0 }
 0x13b   : > { %2038 = vmatpush3.bf16.msra.mxu0 %v2291_v55  ;;  %2086 = vmatpush3.bf16.msra.mxu1 %v2292_v56 }
 0x13c   : > { %2039 = vmatprep.subr.bf16.mxu0 %v2443_v0  ;;  %2087 = vmatprep.subr.bf16.mxu1 %v2443_v0 }
 0x13f   : > { %2040 = vmatpush3.bf16.msra.mxu0 %v2293_v57  ;;  %2088 = vmatpush3.bf16.msra.mxu1 %v2294_v58 }
 0x140   : > { %2041 = vmatprep.subr.bf16.mxu0 %v2443_v0  ;;  %2089 = vmatprep.subr.bf16.mxu1 %v2443_v0 }
 0x143   : > { %2042 = vmatpush3.bf16.msra.mxu0 %v696_v61  ;;  %2090 = vmatpush3.bf16.msra.mxu1 %v960_v62 }
 0x144   : > { %2063 = vmatprep.subr.bf16.mxu0 %v2443_v0  ;;  %2111 = vmatprep.subr.bf16.mxu1 %v2443_v0 }
 0x146   : > { %2044 = vmatmul.mubr.msk.bf16.vlgmr.msra.gmra.mrb[8].mxu0 %vm599_vm5, %v2661_v50  ;;  %2092 = vmatmul.mubr.msk.bf16.vlgmr.msra.gmra.mrb[8].mxu1 %vm599_vm5, %v2661_v50 }
 0x147   : > { %2064 = vmatpush3.bf16.msra.mxu0 %v2297_v63  ;;  %2112 = vmatpush3.bf16.msra.mxu1 %v2298_v1 }
 0x148   : > { %2065 = vmatprep.subr.bf16.mxu0 %v2443_v0  ;;  %2113 = vmatprep.subr.bf16.mxu1 %v2443_v0 }
 0x149   : > { %2075 = vmatprep.mubr.msk.bf16.mxu0 %vm2445_vm4, %v2443_v0  ;;  %2123 = vmatprep.mubr.msk.bf16.mxu1 %vm2445_vm4, %v2443_v0 }
 0x14b   : > { %2066 = vmatpush3.bf16.msra.mxu0 %v2299_v2  ;;  %2114 = vmatpush3.bf16.msra.mxu1 %v2300_v3 }
 0x14c   : > { %2067 = vmatprep.subr.bf16.mxu0 %v2443_v0  ;;  %2115 = vmatprep.subr.bf16.mxu1 %v2443_v0 }
 0x14f   : > { %2068 = vmatpush3.bf16.msra.mxu0 %v2301_v4  ;;  %2116 = vmatpush3.bf16.msra.mxu1 %v2302_v5 }
 0x150   : > { %2069 = vmatprep.subr.bf16.mxu0 %v2443_v0  ;;  %2117 = vmatprep.subr.bf16.mxu1 %v2443_v0 }
 0x153   : > { %2070 = vmatpush3.bf16.msra.mxu0 %v2303_v6  ;;  %2118 = vmatpush3.bf16.msra.mxu1 %v2304_v7 }
 0x154   : > { %2071 = vmatprep.subr.bf16.mxu0 %v2443_v0  ;;  %2119 = vmatprep.subr.bf16.mxu1 %v2443_v0 }
 0x157   : > { %2072 = vmatpush3.bf16.msra.mxu0 %v2305_v8  ;;  %2120 = vmatpush3.bf16.msra.mxu1 %v2306_v9 }
 0x158   : > { %2073 = vmatprep.subr.bf16.mxu0 %v2443_v0  ;;  %2121 = vmatprep.subr.bf16.mxu1 %v2443_v0 }
 0x15b   : > { %2074 = vmatpush3.bf16.msra.mxu0 %v872_v12  ;;  %2122 = vmatpush3.bf16.msra.mxu1 %v1136_v13 }
 0x15c   : > { %2095 = vmatprep.subr.bf16.mxu0 %v2443_v0  ;;  %2143 = vmatprep.subr.bf16.mxu1 %v2443_v0 }
 0x15e   : > { %2076 = vmatmul.mubr.msk.bf16.vlgmr.msra.gmra.mrb[12].mxu0 %vm599_vm5, %v2661_v50  ;;  %2124 = vmatmul.mubr.msk.bf16.vlgmr.msra.gmra.mrb[12].mxu1 %vm599_vm5, %v2661_v50 }
 0x15f   : > { %2096 = vmatpush3.bf16.msra.mxu0 %v2309_v14  ;;  %2144 = vmatpush3.bf16.msra.mxu1 %v2310_v15 }
 0x160   : > { %2097 = vmatprep.subr.bf16.mxu0 %v2443_v0  ;;  %2145 = vmatprep.subr.bf16.mxu1 %v2443_v0 }
 0x161   : > { %2107 = vmatprep.mubr.msk.bf16.mxu0 %vm2445_vm4, %v2443_v0  ;;  %2155 = vmatprep.mubr.msk.bf16.mxu1 %vm2445_vm4, %v2443_v0 }
 0x163   : > { %2098 = vmatpush3.bf16.msra.mxu0 %v2311_v16  ;;  %2146 = vmatpush3.bf16.msra.mxu1 %v2312_v17 }
 0x164   : > { %2099 = vmatprep.subr.bf16.mxu0 %v2443_v0  ;;  %2147 = vmatprep.subr.bf16.mxu1 %v2443_v0 }
 0x167   : > { %2100 = vmatpush3.bf16.msra.mxu0 %v2313_v18  ;;  %2148 = vmatpush3.bf16.msra.mxu1 %v2314_v19 }
 0x168   : > { %2101 = vmatprep.subr.bf16.mxu0 %v2443_v0  ;;  %2149 = vmatprep.subr.bf16.mxu1 %v2443_v0 }
 0x16b   : > { %2102 = vmatpush3.bf16.msra.mxu0 %v2315_v20  ;;  %2150 = vmatpush3.bf16.msra.mxu1 %v2316_v21 }
 0x16c   : > { %2103 = vmatprep.subr.bf16.mxu0 %v2443_v0  ;;  %2151 = vmatprep.subr.bf16.mxu1 %v2443_v0 }
 0x16f   : > { %2104 = vmatpush3.bf16.msra.mxu0 %v2317_v22  ;;  %2152 = vmatpush3.bf16.msra.mxu1 %v2318_v23 }
 0x170   : > { %2105 = vmatprep.subr.bf16.mxu0 %v2443_v0  ;;  %2153 = vmatprep.subr.bf16.mxu1 %v2443_v0 }
 0x173   : > { %2106 = vmatpush3.bf16.msra.mxu0 %v1048_v26  ;;  %2154 = vmatpush3.bf16.msra.mxu1 %v1312_v27  ;;  %v1888_v26 = vld [vmem:[%s2872_s3 + $0x2] sm:$0x3] }
 0x174   : > { %2127 = vmatprep.subr.bf16.mxu0 %v2443_v0  ;;  %2159 = vmatprep.subr.bf16.mxu1 %v2443_v0  ;;  %v2327_v27 = vld [vmem:[%s2874_s5] ss:$8 sps:$4 sm:$0xff]  }
 0x176   : > { %2108 = vmatmul.mubr.msk.bf16.vlgmr.msra.gmra.mrb[16].mxu0 %vm599_vm5, %v2661_v50  ;;  %2156 = vmatmul.mubr.msk.bf16.vlgmr.msra.gmra.mrb[16].mxu1 %vm599_vm5, %v2661_v50 }
 0x177   : > { %2128 = vmatpush3.bf16.msra.mxu0 %v2321_v28  ;;  %2139 = vmatprep.mubr.msk.bf16.mxu0 %vm2445_vm4, %v2443_v0  ;;  %v2329_v28 = vld [vmem:[%s2874_s5 + $0x4] ss:$8 sps:$4 sm:$0xff]  }
 0x178   : > { %2129 = vmatprep.subr.bf16.mxu0 %v2443_v0  ;;  %2165 = vmatprep.mubr.msk.bf16.mxu1 %vm2445_vm4, %v2443_v0 }
 0x17b   : > { %2130 = vmatpush3.bf16.msra.mxu0 %v2322_v29  ;;  %v2332_v29 = vld [vmem:[%s2874_s5 + $0x14] ss:$8 sps:$4 sm:$0xff]  }
 0x17c   : > { %2131 = vmatprep.subr.bf16.mxu0 %v2443_v0 }
 0x17f   : > { %2132 = vmatpush3.bf16.msra.mxu0 %v2323_v30  ;;  %v2335_v30 = vld [vmem:[%s2874_s5 + $0x24] ss:$8 sps:$4 sm:$0xff]  }
 0x180   : > { %2133 = vmatprep.subr.bf16.mxu0 %v2443_v0 }
 0x183   : > { %2134 = vmatpush3.bf16.msra.mxu0 %v2324_v31  ;;  %v2333_v31 = vld [vmem:[%s2874_s5 + $0x20] ss:$8 sps:$4 sm:$0xff]  }
 0x184   : > { %2135 = vmatprep.subr.bf16.mxu0 %v2443_v0 }
 0x187   : > { %2136 = vmatpush3.bf16.msra.mxu0 %v2325_v32  ;;  %v2336_v32 = vld [vmem:[%s2874_s5 + $0x30] ss:$8 sps:$4 sm:$0xff]  }
 0x188   : > { %2137 = vmatprep.subr.bf16.mxu0 %v2443_v0 }
 0x18b   : > { %2138 = vmatpush3.bf16.msra.mxu0 %v1224_v34  ;;  %v2341_v34 = vld [vmem:[%s2874_s5 + $0x44] ss:$8 sps:$4 sm:$0xff]  }
 0x18c   : > { %2179 = vmatprep.subr.bf16.mxu0 %v2443_v0 }
 0x18e   : > { %2140 = vmatmul.mubr.msk.bf16.vlgmr.msra.gmra.mrb[20].mxu0 %vm599_vm5, %v2661_v50 }
 0x18f   : > { %2185 = vmatprep.mubr.msk.bf16.mxu0 %vm2445_vm4, %v2443_v0 }
 0x201   : > { %v644_v36 = vpop.f32.mrb[4].mxu0  ;;  %v820_v37 = vpop.f32.mrb[4].mxu1 }
 0x202   : > { %v2029_v38 = vpop.f32.mrb[5].mxu0  ;;  %v2061_v40 = vpop.f32.mrb[5].mxu1 }
 0x203   : > { %v647_v43 = vpop.f32.mrb[6].mxu0  ;;  %v823_v44 = vpop.f32.mrb[6].mxu1 }
 0x204   : > { %v2030_v45 = vpop.f32.mrb[7].mxu0  ;;  %v2062_v46 = vpop.f32.mrb[7].mxu1 }
 0x205   : > { %v1373_v45 = vlaneseq }
 0x219   : > { %v732_v47 = vpop.f32.mrb[8].mxu0  ;;  %v996_v48 = vpop.f32.mrb[8].mxu1 }
 0x21a   : > { %v1355_v49 = vrot.slane %v732_v47, 4  ;;  %v2045_v51 = vpop.f32.mrb[9].mxu0  ;;  %v2093_v52 = vpop.f32.mrb[9].mxu1 }
 0x21b   : > { %v735_v53 = vpop.f32.mrb[10].mxu0  ;;  %v999_v54 = vpop.f32.mrb[10].mxu1 }
 0x21c   : > { %v1366_v50 = vsel %vm307_vm0, %v644_v36, %v1355_v49  ;;  %v2046_v55 = vpop.f32.mrb[11].mxu0  ;;  %v2094_v56 = vpop.f32.mrb[11].mxu1  ;;  %v2339_v36 = vld [vmem:[%s2874_s5 + $0x40] ss:$8 sps:$4 sm:$0xff]  }
 0x231   : > { %v908_v57 = vpop.f32.mrb[12].mxu0  ;;  %v1172_v58 = vpop.f32.mrb[12].mxu1 }
 0x232   : > { %v1358_v59 = vrot.slane %v908_v57, 4  ;;  %v2077_v60 = vpop.f32.mrb[13].mxu0  ;;  %v2125_v61 = vpop.f32.mrb[13].mxu1 }
 0x233   : > { %v911_v62 = vpop.f32.mrb[14].mxu0  ;;  %v1175_v63 = vpop.f32.mrb[14].mxu1 }
 0x234   : > { %v1367_v1 = vsel %vm307_vm0, %v820_v37, %v1358_v59  ;;  %v2078_v2 = vpop.f32.mrb[15].mxu0  ;;  %v2126_v3 = vpop.f32.mrb[15].mxu1  ;;  %v1597_v37 = vld [vmem:[%s2874_s5 + $0x50] sm:$0x77] }
 0x235   : > { %v1370_v4 = vpack.c.bf16 %v1367_v1, %v1366_v50  ;;  %v1905_v38 = vcombine.high %v1597_v37, %v1597_v37  ;;  %v1904_v40 = vcombine.low %v1597_v37, %v1597_v37  ;;  %v1374_v50 = vand.u32 127, %v1373_v45 }
 0x237   : > { %2160 = vmatpush3.bf16.msra.mxu1 %v1370_v4  ;;  %2180 = vmatpush3.bf16.msra.mxu0 %v1370_v4  ;;  %v1660_v43 = vand.u32 %v1905_v38, %v2643_v35  ;;  %v1657_v44 = vand.u32 %v1904_v40, %v2643_v35  ;;  %vm1475_vm7 = vcmp.ge.s32.totalorder %v1374_v50, 1  ;;  %vm1476_vm8 = vcmp.lt.s32.totalorder %v1374_v50, 5 }
 0x238   : > { %2161 = vmatprep.subr.bf16.mxu1 %v2443_v0  ;;  %2181 = vmatprep.subr.bf16.mxu0 %v2443_v0  ;;  %vm1527_vm9 = vcmp.ge.s32.totalorder %v1374_v50, 5  ;;  %vm1528_vm10 = vcmp.lt.s32.totalorder %v1374_v50, 21  ;;  %vm1477_vm11 = vmand %vm1475_vm7, %vm1476_vm8  ;;  %vm1424_vm12 = vcmp.lt.s32.totalorder %v1374_v50, 1  ;;  %vm1579_vm14 = vcmp.ge.s32.totalorder %v1374_v50, 21 }
 0x239   : > { %vm1529_vm13 = vmand %vm1527_vm9, %vm1528_vm10  ;;  %vm1580_vm15 = vcmp.lt.s32.totalorder %v1374_v50, 85 }
 0x249   : > { %v1084_v5 = vpop.f32.mrb[16].mxu0  ;;  %v1348_v6 = vpop.f32.mrb[16].mxu1 }
 0x24a   : > { %v1361_v7 = vrot.slane %v1084_v5, 4  ;;  %v2109_v8 = vpop.f32.mrb[17].mxu0  ;;  %v2157_v9 = vpop.f32.mrb[17].mxu1  ;;  %v1372_v22 = vpack.c.bf16 %v1348_v6, %v1348_v6 }
 0x24b   : > { %v1087_v10 = vpop.f32.mrb[18].mxu0  ;;  %v1351_v11 = vpop.f32.mrb[18].mxu1 }
 0x24c   : > { %v1368_v12 = vsel %vm307_vm0, %v996_v48, %v1361_v7  ;;  %v2110_v13 = vpop.f32.mrb[19].mxu0  ;;  %v2158_v14 = vpop.f32.mrb[19].mxu1  ;;  %v1381_v23 = vsel %vm603_vm2, %v1372_v22, 0 }
 0x24d   : > { %v299_v7 = vpop.permute.xlu0 %298 }
 0x24e   : > { %v379_v8 = vadd.f32 %v2657_v41, %v299_v7  ;;  %v381_v9 = vadd.f32 %v2659_v42, %v299_v7 }
 0x261   : > { %v1260_v15 = vpop.f32.mrb[20].mxu0 }
 0x262   : > { %v1364_v16 = vrot.slane %v1260_v15, 4  ;;  %v2141_v17 = vpop.f32.mrb[21].mxu0 }
 0x263   : > { %v1263_v18 = vpop.f32.mrb[22].mxu0 }
 0x264   : > { %v1369_v19 = vsel %vm307_vm0, %v1172_v58, %v1364_v16  ;;  %v2142_v20 = vpop.f32.mrb[23].mxu0  ;;  %vm1581_vm0 = vmand %vm1579_vm14, %vm1580_vm15 }
 0x265   : > { %v1371_v21 = vpack.c.bf16 %v1369_v19, %v1368_v12 }
 0x267   : > { %2162 = vmatpush3.bf16.msra.mxu1 %v1371_v21  ;;  %2182 = vmatpush3.bf16.msra.mxu0 %v1371_v21 }
 0x268   : > { %2163 = vmatprep.subr.bf16.mxu1 %v2443_v0  ;;  %2183 = vmatprep.subr.bf16.mxu0 %v2443_v0 }
 0x26b   : > { %2164 = vmatpush3.bf16.msra.mxu1 %v1381_v23  ;;  %2184 = vmatpush3.bf16.msra.mxu0 %v1381_v23 }
 0x26c   : > { %2169 = vmatprep.subr.bf16.mxu1 %v2443_v0  ;;  %1662 = vmatprep.subr.bf16.mxu0 %v2329_v28 }
 0x26e   : > { %2166 = vmatmul.mubr.msk.bf16.vlgmr.msra.gmra.mrb[20].mxu1 %vm1376_vm6, %v1375_v24  ;;  %2186 = vmatmul.mubr.msk.bf16.vlgmr.msra.gmra.mrb[24].mxu0 %vm1376_vm6, %v1890_v25 }
 0x26f   : > { %2170 = vmatpush3.bf16.msra.mxu1 %v1370_v4  ;;  %2175 = vmatprep.mubr.msk.bf16.mxu1 %vm2445_vm4, %v2443_v0 }
 0x270   : > { %2171 = vmatprep.subr.bf16.mxu1 %v2443_v0  ;;  %1694 = vmatprep.mubr.bf16.mxu0 %v2446_v39  ;;  %v1892_v39 = vld [vmem:[%s2872_s3 + $0x6] sm:$0x3] }
 0x271   : > { %1663 = vmatpush1.bf16.msra.mxu0 %v2327_v27 }
 0x272   : > { %1664 = vmatprep.subr.bf16.mxu0 %v2332_v29 }
 0x273   : > { %2172 = vmatpush3.bf16.msra.mxu1 %v1371_v21 }
 0x274   : > { %2173 = vmatprep.subr.bf16.mxu1 %v2443_v0 }
 0x277   : > { %2174 = vmatpush3.bf16.msra.mxu1 %v1381_v23 }
 0x278   : > { %2189 = vmatprep.subr.bf16.mxu1 %v2443_v0 }
 0x27a   : > { %2176 = vmatmul.mubr.msk.bf16.vlgmr.msra.gmra.mrb[24].mxu1 %vm1376_vm6, %v1888_v26 }
 0x27b   : > { %2190 = vmatpush3.bf16.msra.mxu1 %v1370_v4  ;;  %2195 = vmatprep.mubr.msk.bf16.mxu1 %vm2445_vm4, %v2443_v0 }
 0x27c   : > { %2191 = vmatprep.subr.bf16.mxu1 %v2443_v0 }
 0x27f   : > { %2192 = vmatpush3.bf16.msra.mxu1 %v1371_v21 }
 0x280   : > { %2193 = vmatprep.subr.bf16.mxu1 %v2443_v0  ;;  %v2330_v0 = vld [vmem:[%s2874_s5 + $0x10] ss:$8 sps:$4 sm:$0xff]  }
 0x281   : > { %1665 = vmatpush1.bf16.msra.mxu0 %v2330_v0 }
 0x282   : > { %1666 = vmatprep.subr.bf16.mxu0 %v2335_v30 }
 0x283   : > { %2194 = vmatpush3.bf16.msra.mxu1 %v1381_v23 }
 0x285   : > { %1667 = vmatpush1.bf16.msra.mxu0 %v2333_v31 }
 0x286   : > { %2196 = vmatmul.mubr.msk.bf16.vlgmr.msra.gmra.mrb[28].mxu1 %vm1376_vm6, %v1892_v39  ;;  %1668 = vmatprep.subr.bf16.mxu0 %v2338_v33 }
 0x289   : > { %1669 = vmatpush1.bf16.msra.mxu0 %v2336_v32 }
 0x28a   : > { %1670 = vmatprep.subr.bf16.mxu0 %v2341_v34 }
 0x28d   : > { %1671 = vmatpush1.bf16.msra.mxu0 %v2339_v36 }
 0x28e   : > { %1672 = vmatprep.subr.bf16.mxu0 %v1660_v43 }
 0x291   : > { %1673 = vmatpush1.bf16.msra.mxu0 %v1657_v44 }
 0x341   : > { %v1417_v46 = vpop.f32.mrb[20].mxu1  ;;  %v1521_v47 = vpop.f32.mrb[24].mxu0 }
 0x342   : > { %v2167_v48 = vpop.f32.mrb[21].mxu1  ;;  %v2187_v49 = vpop.f32.mrb[25].mxu0  ;;  %v1428_v55 = vsel %vm1424_vm12, %v1417_v46, 0.0  ;;  %v1532_v58 = vsel %vm1529_vm13, %v1521_v47, 0.0 }
 0x343   : > { %v1420_v51 = vpop.f32.mrb[22].mxu1  ;;  %v1524_v52 = vpop.f32.mrb[26].mxu0 }
 0x344   : > { %v2168_v53 = vpop.f32.mrb[23].mxu1  ;;  %v2188_v54 = vpop.f32.mrb[27].mxu0 }
 0x34d   : > { %v1469_v35 = vpop.f32.mrb[24].mxu1 }
 0x34e   : > { %v1480_v56 = vsel %vm1477_vm11, %v1469_v35, 0.0  ;;  %v2177_v57 = vpop.f32.mrb[25].mxu1 }
 0x34f   : > { %v1481_v59 = vadd.f32 %v1480_v56, %v1428_v55  ;;  %v1472_v60 = vpop.f32.mrb[26].mxu1 }
 0x350   : > { %v2178_v61 = vpop.f32.mrb[27].mxu1 }
 0x351   : > { %v1533_v62 = vadd.f32 %v1532_v58, %v1481_v59 }
 0x359   : > { %v1573_v63 = vpop.f32.mrb[28].mxu1 }
 0x35a   : > { %v1584_v1 = vsel %vm1581_vm0, %v1573_v63, 0.0  ;;  %v2197_v2 = vpop.f32.mrb[29].mxu1 }
 0x35b   : > { %v1585_v3 = vadd.f32 %v1584_v1, %v1533_v62  ;;  %v1576_v4 = vpop.f32.mrb[30].mxu1 }
 0x35c   : > { %v2198_v5 = vpop.f32.mrb[31].mxu1 }
 0x35d   : > { %v1586_v6 = vpack.c.bf16 %v1585_v3, %v1585_v3 }
 0x35f   : > { %1906 = vmatmul.mubr.msk.bf16.vlgmr.msra.gmra.mrb[28].mxu0 %vm599_vm5, %v1586_v6 }
 0x432   : > { %v1696_v10 = vpop.f32.mrb[28].mxu0 }
 0x433   : > { %v1703_v11 = vadd.f32 %v1696_v10, %v379_v8  ;;  %v1698_v12 = vpop.f32.mrb[29].mxu0 }
 0x434   : > { %v1704_v13 = vadd.f32 %v1698_v12, %v381_v9  ;;  %v1700_v14 = vpop.f32.mrb[30].mxu0 }
 0x435   : > { %v1701_v15 = vpop.f32.mrb[31].mxu0 }
 0x436   : > { %v1707_v16 = vcombine.low %v1703_v11, %v1704_v13 }
 0x438   : > { %1709 = vst [vmem:[%s286_s13] sm:$0xff] %v1707_v16 }
 0x439   : > { %2385 = shalt.err (!%p2382_p7)
}
 0x43a   : > { %s2386_s17 = scalar_lea.hbm %s2827_s23, 128  ;;  %s2390_s16 = scalar_lea.hbm %s2876_s7, 256 }
 0x43b   : > { %p2387_p8 = scmp.ne.s32.totalorder %s2827_s23, %s2386_s17  ;;  %p2391_p1 = scmp.lt.u32.totalorder %s2827_s23, %s2876_s7 }
 0x43c   : > { %p2392_p0 = scmp.lt.u32.totalorder %s2390_s16, %s2386_s17  ;;  %p2394_p6 = scmp.lt.u32.totalorder %s2386_s17, %s2827_s23 }
 0x43d   : > { %p2388_p11 = pnand %p2387_p8, %p2887_p9 }
 0x43e   : > { %p2393_p5 = por %p2392_p0, %p2391_p1 }
 0x43f   : > { %p2389_p13 = pneg %p2388_p11 }
 0x440   : > { %p2395_p10 = por %p2394_p6, %p2393_p5 }
 0x442   : > { %p2396_p12 = pnand %p2395_p10, %p2389_p13 }
 0x444   : > { %2399 = shalt.err (!%p2396_p12)
}
 0x445   : > { %2203 = dma.vmem_to_hbm [thread:$0]  (%p2887_p9), %s2829_s20, 128, %s2827_s23, %s1711_s29  }
 0x446 PF: > { %p2215_p2 = scmp.ge.s32.totalorder %s2438_s27, 2  ;;  %s1737_s21 = sand.u32 1, %s2426_s24  }
 0x447   : > { %p2888_p3 = scmp.ne.s32.totalorder %s2881_s12, 0  ;;  %s1738_s22 = scalar_lea.sflag [#allocation4], %s1737_s21 }
 0x449   : > { %p2210_p4 = pnand %p2215_p2, %p2888_p3 }
 0x44b   : > { %2421 = dma.done.wait (!%p2210_p4), %s1738_s22, 128  }
 0x44c   : > { %2423 = vsyncadd (!%p2210_p4), %s1738_s22, 4294967168  ;;  %p18_p7 = scmp.ge.s32.totalorder %s2513_s30, 4   ;;  %s2889_s24 = smov %s2430_s25 }
 0x44d   : > { %s2890_s25 = smov %s2434_s26  ;;  %s2891_s26 = smov %s2524_s10 }
 0x44e   : > { %s2892_s27 = smov %s2513_s30  ;;  %20 = sbr.rel (!%p18_p7) target bundleno = 4 (0x4), region = 99 }
 0x455   :  { %1743 = vsyncpa [#allocation3], 1 }
 0x456   :  { %1745 = vsyncpa [#allocation3 + $0x1], 1 }
 0x457   :  { %1746 = vsyncpa [#allocation4], 1 }
 0x458   :  { %1748 = vsyncpa [#allocation4 + $0x1], 1 }

</bundles_post_ra>
